<compile_context>
chip_gen: v7x
topology: tpu7x:2x2x1
jax: 0.10.0
libtpu: 0.0.40
codegen_flags: <defaults>
</compile_context>

<pallas_src>
import jax
import jax.numpy as jnp
from jax import lax
from jax.experimental import pallas as pl
from jax.experimental.pallas import tpu as pltpu


def _round_up(n, m):
    return ((n + m - 1) // m) * m


def _mlp_kernel(x_ref, w1_ref, b1_ref, w2_ref, b2_ref, w3_ref, b3_ref, o_ref):
    # x_ref : (tm, D)   activations (f32 at the HBM boundary)
    # w1_ref: (D, 64)   w2_ref: (64, 32)   -- VMEM-resident (constant index_map)
    # b1_ref: (1, 64)   b2_ref: (1, 32)    -- f32
    # w3_ref: (8, 32)   fc3 weight row broadcast over 8 sublanes (MXU-friendly)
    # b3_ref: (1, 1)    f32 scalar in SMEM
    # o_ref : (1, tm)   lane-dense output row
    cdt = w1_ref.dtype

    # fc1 + ReLU (MXU, f32 accumulation). Cast x in-kernel so the wrapper never
    # rewrites x in HBM just to change dtype.
    x = x_ref[...].astype(cdt)
    h1 = jnp.dot(x, w1_ref[...], preferred_element_type=jnp.float32)
    h1 = jnp.maximum(h1 + b1_ref[...], 0.0)

    # fc2 + ReLU (MXU, f32 accumulation).
    h2 = jnp.dot(h1.astype(cdt), w2_ref[...], preferred_element_type=jnp.float32)
    h2 = jnp.maximum(h2 + b2_ref[...], 0.0)

    # fc3 (32 -> 1), produced lane-dense: contract the 32-wide hidden dim of
    # w3 (8,32) against h2 (tm,32) ("NT" matmul) giving (8, tm); keep row 0
    # and add the scalar bias from SMEM.
    out8 = lax.dot_general(
        w3_ref[...], h2.astype(cdt),
        dimension_numbers=(((1,), (1,)), ((), ())),
        preferred_element_type=jnp.float32)               # (8, tm)
    o_ref[...] = (out8[0:1, :] + b3_ref[0, 0]).astype(o_ref.dtype)


def neural_net_forward(x, params, *, compute_dtype=jnp.float32, tile_m=4096,
                       use_core_parallel=False):
    """x: (B, input_size) float32 -> (B, 1) float32."""
    w1, b1, w2, b2, w3, b3 = params
    B, D = x.shape
    H1 = w1.shape[1]   # 64
    H2 = w2.shape[1]   # 32

    # Batch tile: one rounded tile for small B, otherwise a large lane-friendly
    # tile (multiple of 128 so the (1, tm) output blocks tile the lane axis
    # cleanly).  No padding of x: Pallas pads the tail input block, and the
    # corresponding garbage output lanes are discarded by the final slice.
    if B <= int(tile_m):
        tm = _round_up(B, 8)
    else:
        tm = _round_up(min(int(tile_m), B), 128)
    grid = (pl.cdiv(B, tm),)
    out_w = grid[0] * tm          # every output block fully in bounds

    cdt = jnp.dtype(compute_dtype)
    w1_c = w1.astype(cdt)
    w2_c = w2.astype(cdt)
    w3_blk = jnp.broadcast_to(w3.reshape(1, H2), (8, H2)).astype(cdt)
    b1_f = b1.reshape(1, H1).astype(jnp.float32)
    b2_f = b2.reshape(1, H2).astype(jnp.float32)
    b3_s = b3.reshape(1, 1).astype(jnp.float32)

    # VMEM budget: x tile is lane-padded to 128 lanes (D < 128); output row is
    # sublane-padded to 8.  x2 for double buffering + headroom for the
    # compiler-managed h1/h2 temporaries.  Clamp below v7x's 64 MiB physical;
    # this also raises v5e's 16 MiB default scoped limit for big tiles.
    x_tile_bytes = tm * max(D, 128) * x.dtype.itemsize
    o_tile_bytes = 8 * _round_up(tm, 128) * 4
    vmem_limit = int(min(max(2 * (x_tile_bytes + o_tile_bytes) + (8 << 20),
                             32 << 20), 56 << 20))

    # On v7x pass use_core_parallel=True to shard the batch axis across both
    # TensorCores; plain "parallel" keeps single-core chips (v5e/v6e) happy.
    sem = pltpu.CORE_PARALLEL if use_core_parallel else "parallel"

    flops = 2 * B * (D * H1 + H1 * H2 + H2)
    bytes_accessed = (
        x.size * x.dtype.itemsize + B * 4
        + (w1_c.size + w2_c.size + w3_blk.size) * cdt.itemsize
        + (b1_f.size + b2_f.size + b3_s.size) * 4)

    out_row = pl.pallas_call(
        _mlp_kernel,
        out_shape=jax.ShapeDtypeStruct((1, out_w), jnp.float32),
        grid=grid,
        in_specs=[
            pl.BlockSpec((tm, D), lambda i: (i, 0)),       # x: batch-tiled
            pl.BlockSpec((D, H1), lambda i: (0, 0)),       # w1: pinned in VMEM
            pl.BlockSpec((1, H1), lambda i: (0, 0)),       # b1
            pl.BlockSpec((H1, H2), lambda i: (0, 0)),      # w2
            pl.BlockSpec((1, H2), lambda i: (0, 0)),       # b2
            pl.BlockSpec((8, H2), lambda i: (0, 0)),       # w3 row (8 sublanes)
            pl.BlockSpec((1, 1), lambda i: (0, 0),
                         memory_space=pltpu.MemorySpace.SMEM),  # b3 scalar
        ],
        out_specs=pl.BlockSpec((1, tm), lambda i: (0, i)),  # lane-dense output
        compiler_params=pltpu.CompilerParams(
            dimension_semantics=(sem,),
            vmem_limit_bytes=vmem_limit),
        cost_estimate=pl.CostEstimate(
            flops=flops, transcendentals=0, bytes_accessed=bytes_accessed),
    )(x, w1_c, b1_f, w2_c, b2_f, w3_blk, b3_s)

    return out_row.reshape(out_w, 1)[:B]


def init_params(key, input_size):
    """Deterministic init mimicking torch.nn.Linear defaults
    (uniform(-1/sqrt(fan_in), 1/sqrt(fan_in)) for weights and biases)."""
    dims = [(input_size, 64), (64, 32), (32, 1)]
    params = []
    for fan_in, fan_out in dims:
        key, kw, kb = jax.random.split(key, 3)
        bound = 1.0 / jnp.sqrt(jnp.float32(fan_in))
        w = jax.random.uniform(kw, (fan_in, fan_out), jnp.float32, -bound, bound)
        b = jax.random.uniform(kb, (1, fan_out), jnp.float32, -bound, bound)
        params += [w, b]
    return tuple(params)


def _reference_forward(x, params):
    w1, b1, w2, b2, w3, b3 = params
    h1 = jnp.maximum(x @ w1 + b1, 0.0)
    h2 = jnp.maximum(h1 @ w2 + b2, 0.0)
    return h2 @ w3 + b3


# TODO(synk): the training-side pieces of the original script (DataLoader,
# optimizer, loss) are outside the forward pass and are not implemented here.

if __name__ == "__main__":
    key = jax.random.PRNGKey(0)
    batch, input_size = 8, 16

    k_x, k_p, k_x2 = jax.random.split(key, 3)
    x = jax.random.normal(k_x, (batch, input_size), jnp.float32)
    params = init_params(k_p, input_size)
    ref = _reference_forward(x, params)

    # f32 path (bit-faithful to the PyTorch module semantics), single tile.
    out = jax.block_until_ready(neural_net_forward(x, params))
    assert out.shape == (batch, 1)
    assert jnp.allclose(out, ref, atol=1e-5, rtol=1e-5), "f32 mismatch vs reference"

    # Multi-tile grid, unpadded batch (B=600 not a multiple of the 512 tile):
    # exercises the partially-out-of-bounds tail input block + output slice.
    x_big = jax.random.normal(k_x2, (600, input_size), jnp.float32)
    ref_big = _reference_forward(x_big, params)
    out_big = jax.block_until_ready(neural_net_forward(x_big, params, tile_m=512))
    assert out_big.shape == (600, 1)
    assert jnp.allclose(out_big, ref_big, atol=1e-4, rtol=1e-4), "tiled mismatch"

    # Same batch through the default (single large tile) path.
    out_big1 = jax.block_until_ready(neural_net_forward(x_big, params))
    assert jnp.allclose(out_big1, ref_big, atol=1e-4, rtol=1e-4), "single-tile mismatch"

    # bf16 MXU path: x stays f32 in HBM, cast in-kernel; f32 accumulation.
    out_bf16 = jax.block_until_ready(
        neural_net_forward(x, params, compute_dtype=jnp.bfloat16))
    assert jnp.allclose(out_bf16, ref, atol=5e-2, rtol=5e-2), "bf16 mismatch"

    print("KERNEL_OK")
</pallas_src>

<mosaic_0001>
module attributes {stable_mosaic.version = 11 : i64} {
  func.func @_mlp_kernel(%arg0: i32, %arg1: memref<8x16xf32, #tpu.memory_space<vmem>>, %arg2: memref<16x64xf32, #tpu.memory_space<vmem>>, %arg3: memref<1x64xf32, #tpu.memory_space<vmem>>, %arg4: memref<64x32xf32, #tpu.memory_space<vmem>>, %arg5: memref<1x32xf32, #tpu.memory_space<vmem>>, %arg6: memref<8x32xf32, #tpu.memory_space<vmem>>, %arg7: memref<1x1xf32, #tpu.memory_space<smem>>, %arg8: memref<1x8xf32, #tpu.memory_space<vmem>>) attributes {dimension_semantics = [#tpu.dimension_semantics<parallel>], iteration_bounds = array<i64: 1>, scalar_prefetch = 0 : i64, scratch_operands = 0 : i64, tpu.core_type = #tpu.core_type<tc>, window_params = [{transform_indices = @transform_0, window_bounds = array<i64: 8, 16>}, {pipeline_mode = #tpu.pipeline_mode<synchronous>, transform_indices = @transform_1, window_bounds = array<i64: 16, 64>}, {pipeline_mode = #tpu.pipeline_mode<synchronous>, transform_indices = @transform_2, window_bounds = array<i64: 1, 64>}, {pipeline_mode = #tpu.pipeline_mode<synchronous>, transform_indices = @transform_3, window_bounds = array<i64: 64, 32>}, {pipeline_mode = #tpu.pipeline_mode<synchronous>, transform_indices = @transform_4, window_bounds = array<i64: 1, 32>}, {pipeline_mode = #tpu.pipeline_mode<synchronous>, transform_indices = @transform_5, window_bounds = array<i64: 8, 32>}, {transform_indices = @transform_6, window_bounds = array<i64: 1, 1>}, {transform_indices = @transform_7, window_bounds = array<i64: 1, 8>}]} {
    %c0 = arith.constant 0 : index
    %c0_0 = arith.constant 0 : index
    %0 = vector.load %arg1[%c0, %c0_0] : memref<8x16xf32, #tpu.memory_space<vmem>>, vector<8x16xf32>
    %c0_1 = arith.constant 0 : index
    %c0_2 = arith.constant 0 : index
    %1 = vector.load %arg2[%c0_1, %c0_2] : memref<16x64xf32, #tpu.memory_space<vmem>>, vector<16x64xf32>
    %cst = arith.constant dense<0.000000e+00> : vector<8x64xf32>
    %2 = tpu.matmul %0, %1, %cst {dimension_numbers = #tpu.dot_dimension_numbers<[1], [0], [0], [1], [0, 0, 1, 1], [], []>} : vector<8x16xf32>, vector<16x64xf32>, vector<8x64xf32> -> vector<8x64xf32>
    %c0_3 = arith.constant 0 : index
    %c0_4 = arith.constant 0 : index
    %3 = vector.load %arg3[%c0_3, %c0_4] : memref<1x64xf32, #tpu.memory_space<vmem>>, vector<1x64xf32>
    %4 = vector.broadcast %3 : vector<1x64xf32> to vector<8x64xf32>
    %5 = arith.addf %2, %4 : vector<8x64xf32>
    %cst_5 = arith.constant 0.000000e+00 : f32
    %6 = vector.broadcast %cst_5 : f32 to vector<8x64xf32>
    %7 = arith.maximumf %5, %6 : vector<8x64xf32>
    %c0_6 = arith.constant 0 : index
    %c0_7 = arith.constant 0 : index
    %8 = vector.load %arg4[%c0_6, %c0_7] : memref<64x32xf32, #tpu.memory_space<vmem>>, vector<64x32xf32>
    %cst_8 = arith.constant dense<0.000000e+00> : vector<8x32xf32>
    %9 = tpu.matmul %7, %8, %cst_8 {dimension_numbers = #tpu.dot_dimension_numbers<[1], [0], [0], [1], [0, 0, 1, 1], [], []>} : vector<8x64xf32>, vector<64x32xf32>, vector<8x32xf32> -> vector<8x32xf32>
    %c0_9 = arith.constant 0 : index
    %c0_10 = arith.constant 0 : index
    %10 = vector.load %arg5[%c0_9, %c0_10] : memref<1x32xf32, #tpu.memory_space<vmem>>, vector<1x32xf32>
    %11 = vector.broadcast %10 : vector<1x32xf32> to vector<8x32xf32>
    %12 = arith.addf %9, %11 : vector<8x32xf32>
    %cst_11 = arith.constant 0.000000e+00 : f32
    %13 = vector.broadcast %cst_11 : f32 to vector<8x32xf32>
    %14 = arith.maximumf %12, %13 : vector<8x32xf32>
    %c0_12 = arith.constant 0 : index
    %c0_13 = arith.constant 0 : index
    %15 = vector.load %arg6[%c0_12, %c0_13] : memref<8x32xf32, #tpu.memory_space<vmem>>, vector<8x32xf32>
    %cst_14 = arith.constant dense<0.000000e+00> : vector<8x8xf32>
    %16 = tpu.matmul %15, %14, %cst_14 {dimension_numbers = #tpu.dot_dimension_numbers<[1], [1], [0], [0], [0, 0, 1, 0], [], []>} : vector<8x32xf32>, vector<8x32xf32>, vector<8x8xf32> -> vector<8x8xf32>
    %17 = vector.extract_strided_slice %16 {offsets = [0, 0], sizes = [1, 8], strides = [1, 1]} : vector<8x8xf32> to vector<1x8xf32>
    %c0_15 = arith.constant 0 : index
    %c0_16 = arith.constant 0 : index
    %18 = memref.load %arg7[%c0_15, %c0_16] : memref<1x1xf32, #tpu.memory_space<smem>>
    %19 = vector.broadcast %18 : f32 to vector<1x8xf32>
    %20 = arith.addf %17, %19 : vector<1x8xf32>
    %c0_17 = arith.constant 0 : index
    %c0_18 = arith.constant 0 : index
    %21 = vector.load %arg8[%c0_17, %c0_18] : memref<1x8xf32, #tpu.memory_space<vmem>>, vector<1x8xf32>
    tpu.vector_store %arg8[%c0_17, %c0_18], %20 {strides = array<i32>} : memref<1x8xf32, #tpu.memory_space<vmem>>, vector<1x8xf32>,
    return
  }
  func.func @transform_0(%arg0: i32) -> (i32, i32) {
    %c0_i32 = arith.constant 0 : i32
    %c0_i32_0 = arith.constant 0 : i32
    return %arg0, %c0_i32 : i32, i32
  }
  func.func @transform_1(%arg0: i32) -> (i32, i32) {
    %c0_i32 = arith.constant 0 : i32
    %c0_i32_0 = arith.constant 0 : i32
    %c0_i32_1 = arith.constant 0 : i32
    return %c0_i32, %c0_i32_0 : i32, i32
  }
  func.func @transform_2(%arg0: i32) -> (i32, i32) {
    %c0_i32 = arith.constant 0 : i32
    %c0_i32_0 = arith.constant 0 : i32
    %c0_i32_1 = arith.constant 0 : i32
    return %c0_i32, %c0_i32_0 : i32, i32
  }
  func.func @transform_3(%arg0: i32) -> (i32, i32) {
    %c0_i32 = arith.constant 0 : i32
    %c0_i32_0 = arith.constant 0 : i32
    %c0_i32_1 = arith.constant 0 : i32
    return %c0_i32, %c0_i32_0 : i32, i32
  }
  func.func @transform_4(%arg0: i32) -> (i32, i32) {
    %c0_i32 = arith.constant 0 : i32
    %c0_i32_0 = arith.constant 0 : i32
    %c0_i32_1 = arith.constant 0 : i32
    return %c0_i32, %c0_i32_0 : i32, i32
  }
  func.func @transform_5(%arg0: i32) -> (i32, i32) {
    %c0_i32 = arith.constant 0 : i32
    %c0_i32_0 = arith.constant 0 : i32
    %c0_i32_1 = arith.constant 0 : i32
    return %c0_i32, %c0_i32_0 : i32, i32
  }
  func.func @transform_6(%arg0: i32) -> (i32, i32) {
    %c0_i32 = arith.constant 0 : i32
    %c0_i32_0 = arith.constant 0 : i32
    %c0_i32_1 = arith.constant 0 : i32
    return %c0_i32, %c0_i32_0 : i32, i32
  }
  func.func @transform_7(%arg0: i32) -> (i32, i32) {
    %c0_i32 = arith.constant 0 : i32
    %c0_i32_0 = arith.constant 0 : i32
    return %c0_i32, %arg0 : i32, i32
  }
}

</mosaic_0001>

<bundles_post_ra>
// kernel: tpu_custom_call.1
= control target key start
LH: loop header
LB: loop body
LE: loop exit
PB: predicated region body
PF: predicated region fallthrough
CT: control target
= control target key end

     0   :  { %v394_v2 = vmov 0.0|0.0   ;;  %vm395_vm0 = vmmov 0   ;;  %v396_v4 = vmov 0.0   ;;  %vm38_vm1 = vcmask 130048   ;;  %s498_s0 = inlined_call_operand.vmem [shape: f32[8,16], index: 0, kind: input, shape index: {}]   ;;  %s499_s1 = inlined_call_operand.vmem [shape: f32[16,64], index: 1, kind: input, shape index: {}]   ;;  %s500_s2 = inlined_call_operand.vmem [shape: f32[1,64], index: 2, kind: input, shape index: {}]   ;;  %s501_s3 = inlined_call_operand.vmem [shape: f32[64,32], index: 3, kind: input, shape index: {}]   ;;  %s502_s4 = inlined_call_operand.vmem [shape: f32[1,32], index: 4, kind: input, shape index: {}]   ;;  %s503_s5 = inlined_call_operand.vmem [shape: f32[8,32], index: 5, kind: input, shape index: {}]   ;;  %s504_s6 = inlined_call_operand.<no memory space> [shape: f32[1,1], index: 6, kind: input, shape index: {}]   ;;  %s505_s7 = inlined_call_operand.hbm [shape: f32[1,8], index: 7, kind: output, shape index: {}]  }
   0x1   :  { %v29_v0 = vld [vmem:[%s499_s1] sm:$0xff]  ;;  %v30_v1 = vld [vmem:[%s499_s1 + $0x8] sm:$0xff]  ;;  %351 = vmatprep.subr.bf16.mxu0 %v394_v2  ;;  %324 = vmatprep.mubr.msk.f32.mxu0 %vm395_vm0, %v396_v4  ;;  %v115_v7 = vld [vmem:[%s501_s3 + $0x10] sm:$0xff] }
   0x2   :  { %v352_v3 = vpack.c.bf16 %v30_v1, %v29_v0  ;;  %v113_v5 = vld [vmem:[%s501_s3] sm:$0xff]  ;;  %v114_v6 = vld [vmem:[%s501_s3 + $0x8] sm:$0xff]  ;;  %354 = vmatprep.subr.bf16.mxu1 %v394_v2  ;;  %v116_v9 = vld [vmem:[%s501_s3 + $0x18] sm:$0xff]  ;;  %343 = vmatprep.mubr.msk.f32.mxu1 %vm395_vm0, %v396_v4 }
   0x3   :  { %v355_v8 = vpack.c.bf16 %v114_v6, %v113_v5  ;;  %v28_v10 = vld [vmem:[%s498_s0] sm:$0xff] }
   0x4   :  { %353 = vmatpush3.bf16.msra.mxu0 %v352_v3 }
   0x5   :  { %13 = vsyncpa [#allocation4], 0  ;;  %356 = vmatpush3.bf16.msra.mxu1 %v355_v8  ;;  %v358_v11 = vpack.c.bf16 %v116_v9, %v115_v7  ;;  %346 = vmatprep.subr.mxu0 %v396_v4  ;;  %v117_v12 = vld [vmem:[%s501_s3 + $0x20] sm:$0xff]  ;;  %v118_v13 = vld [vmem:[%s501_s3 + $0x28] sm:$0xff]  ;;  %vm128_vm2 = vcmask 523264   ;;  %vm204_vm3 = vcmask 261120   ;;  %v282_v29 = vstv %s504_s6 }
   0x6   :  { %357 = vmatprep.subr.bf16.mxu1 %v394_v2  ;;  %v361_v14 = vpack.c.bf16 %v118_v13, %v117_v12  ;;  %v119_v15 = vld [vmem:[%s501_s3 + $0x30] sm:$0xff]  ;;  %v120_v16 = vld [vmem:[%s501_s3 + $0x38] sm:$0xff]  ;;  %v300_v18 = vld [vmem:[%s500_s2] ss:$0 sm:$0xff]  ;;  %s397_s27 = smov [#allocation3]   ;;  %vm284_vm4 = vcmask 57344  }
   0x7   :  { %325 = vmatmul.mubr.msk.f32.vlgmr.msra.gmra.mrb[0].mxu0 %vm38_vm1, %v28_v10  ;;  %v364_v17 = vpack.c.bf16 %v120_v16, %v119_v15  ;;  %v302_v23 = vld [vmem:[%s502_s4] ss:$0 sm:$0xff]  ;;  %s292_s28 = sshll.u32 %s397_s27, 4  ;;  %s293_s28 = int_to_ptr.vmem [resolvable:$true] %s292_s28 }
   0x8   :  { %348 = vmatprep.mubr.msk.f32.mxu0 %vm395_vm0, %v396_v4  ;;  %v203_v28 = vld [vmem:[%s503_s5] sm:$0xff]  ;;  %s370_s4 = scalar_lea.vmem %s293_s28, 16  ;;  %s374_s29 = scalar_lea.vmem %s293_s28, 32 }
   0x9   :  { %359 = vmatpush3.bf16.msra.mxu1 %v358_v11  ;;  %p371_p0 = scmp.ne.s32.totalorder %s293_s28, %s370_s4  ;;  %p375_p1 = scmp.lt.s32.totalorder %s293_s28, %s293_s28 }
   0xa   :  { %360 = vmatprep.subr.bf16.mxu1 %v394_v2  ;;  %p376_p2 = scmp.lt.s32.totalorder %s374_s29, %s370_s4 }
   0xc   :  { %p377_p3 = por %p376_p2, %p375_p1 }
   0xd   :  { %362 = vmatpush3.bf16.msra.mxu1 %v361_v14 }
   0xe   :  { %363 = vmatprep.subr.bf16.mxu1 %v394_v2  ;;  %p378_p4 = pnand %p377_p3, %p371_p0 }
  0x11   :  { %365 = vmatpush3.bf16.msra.mxu1 %v364_v17 }
  0xda   :  { %v108_v19 = vpop.f32.mrb[0].mxu0 }
  0xdb   :  { %v109_v20 = vadd.f32 %v300_v18, %v108_v19  ;;  %v326_v21 = vpop.f32.mrb[1].mxu0 }
  0xdd   :  { %v112_v22 = vmax.f32 %v109_v20, 0.0 }
  0xdf   :  { %344 = vmatmul.mubr.msk.f32.vlgmr.msra.gmra.mrb[0].mxu1 %vm128_vm2, %v112_v22 }
 0x1b2   :  { %v198_v24 = vpop.f32.mrb[0].mxu1 }
 0x1b3   :  { %v199_v25 = vadd.f32 %v302_v23, %v198_v24  ;;  %v345_v26 = vpop.f32.mrb[1].mxu1 }
 0x1b5   :  { %v202_v27 = vmax.f32 %v199_v25, 0.0 }
 0x1b7   :  { %347 = vmatpush3.xpose.msk.msra.mxu0 %vm204_vm3, %v202_v27 }
 0x1ba   :  { %349 = vmatmul.mubr.msk.f32.vlgmr.msra.gmra.mrb[2].mxu0 %vm204_vm3, %v203_v28 }
 0x28d   :  { %v277_v30 = vpop.f32.mrb[2].mxu0 }
 0x28e   :  { %v283_v31 = vadd.f32 %v282_v29, %v277_v30  ;;  %v350_v32 = vpop.f32.mrb[3].mxu0 }
 0x290   :  { %285 = vst.msk [vmem:[#allocation3] sm:$0x1] %vm284_vm4, %v283_v31 }
 0x291   :  { %381 = shalt.err (!%p378_p4)
}
 0x292   :  { %s382_s6 = scalar_lea.hbm %s505_s7, 16 }
 0x293   :  { %p383_p5 = scmp.ne.s32.totalorder %s505_s7, %s382_s6  ;;  %p386_p6 = scmp.lt.u32.totalorder %s382_s6, %s505_s7 }
 0x295   :  { %p388_p7 = pnand %p386_p6, %p383_p5 }
 0x297   :  { %391 = shalt.err (!%p388_p7)
}
 0x298   :  { %295 = dma.vmem_to_hbm [thread:$0]  %s293_s28, 16, %s505_s7, [#allocation4]  }
 0x299   :  { %392 = dma.done.wait [#allocation4], 16  }
 0x29a   :  { %393 = vsyncadd [#allocation4], 4294967280 }
 0x29b   :  { %299 = vsyncpa [#allocation4], 1 }

</bundles_post_ra>
